<compile_context>
chip_gen: v5e
topology: v5e:2x2
jax: 0.10.0
libtpu: 0.0.40
codegen_flags: <defaults>
</compile_context>

<pallas_src>
import functools

import jax
import jax.numpy as jnp
import numpy as np
from jax.experimental import pallas as pl
from jax.experimental.pallas import tpu as pltpu


def _round_up(x, m):
    return ((x + m - 1) // m) * m


# ----------------------------------------------------------------------------
# Fused kernel: hoisted input projection -> unrolled fused LSTM recurrence ->
# fc1 -> relu -> fc2 -> relu -> out, one lane-dense output slab.
# ----------------------------------------------------------------------------
def _make_fused_kernel(T, BP, H, D, L):
    H2 = 2 * H                      # fused hidden width  [h0 | h2]
    G = 8 * H                       # fused gate width    [i0 i2|f0 f2|g0 g2|o0 o2]
    D2 = 2 * D                      # fused input width   [x0 | x2]
    R_IH = _round_up(D2, 8)         # row offset of whh inside the LSTM bundle

    def kernel(x_ref, lstm_ref, mlp_ref, out_ref, gx_scr):
        # ---- static views into the packed parameter bundles ----------------
        wih = lstm_ref[0:D2, :]                         # (2D, 8H)
        whh = lstm_ref[R_IH:R_IH + H2, :]               # (2H, 8H) block-diag
        bias = lstm_ref[R_IH + H2:R_IH + H2 + 1, :]     # (1, 8H)

        fc1w = mlp_ref[0:H2, :]                         # (2H, L)
        fc2w = mlp_ref[H2:H2 + L, :]                    # (L, L)
        outw = mlp_ref[H2 + L:H2 + 2 * L, :]            # (L, L)
        bvec = mlp_ref[H2 + 2 * L:H2 + 2 * L + 8, :]    # (8, L)
        fc1b = bvec[0:1, :]
        fc2b = bvec[1:2, :]
        outb = bvec[2:3, :]

        # ---- hoisted input projection for ALL timesteps (off the serial
        #      recurrence chain): (T*BP, 2D) @ (2D, 8H) + bias ----------------
        gx_scr[...] = (jnp.dot(x_ref[...], wih,
                               preferred_element_type=jnp.float32) + bias)

        h = jnp.zeros((BP, H2), jnp.float32)            # [h0 | h2]
        c = jnp.zeros((BP, H2), jnp.float32)            # [c0 | c2]

        # ---- fully unrolled recurrence (static T): one matmul on the serial
        #      path per step; ONE 256-lane tanh (i/f/o columns pre-scaled by
        #      0.5, so their sigmoids are a cheap VPU fma off the same tanh).
        for t in range(T):
            gx_t = gx_scr[t * BP:(t + 1) * BP, :]       # tile-aligned (BP, 8H)
            gates = jnp.dot(h, whh,
                            preferred_element_type=jnp.float32) + gx_t
            th = jnp.tanh(gates)                        # single EUP pass
            sg = 0.5 * th + 0.5                         # sigmoid(i/f/o) on VPU
            i_g = sg[:, 0 * H2:1 * H2]
            f_g = sg[:, 1 * H2:2 * H2]
            g_g = th[:, 2 * H2:3 * H2]
            o_g = sg[:, 3 * H2:4 * H2]
            c = f_g * c + i_g * g_g
            h = o_g * jnp.tanh(c)

        # ---- MLP head at uniform 128-lane width (single-pass MXU matmuls) --
        x1 = jnp.maximum(
            jnp.dot(h, fc1w, preferred_element_type=jnp.float32) + fc1b, 0.0)
        x2 = jnp.maximum(
            jnp.dot(x1, fc2w, preferred_element_type=jnp.float32) + fc2b, 0.0)
        q = jnp.dot(x2, outw, preferred_element_type=jnp.float32) + outb

        # Single lane-dense output slab: [h0|h2 | c0|c2 | q_padded].
        out_ref[...] = jnp.concatenate([h, c, q], axis=-1)

    return kernel


# ----------------------------------------------------------------------------
# Parameter construction (raw PyTorch layout) + one-time kernel-form prep.
# ----------------------------------------------------------------------------
def init_params(key, state_dim, hidden_dim, action_dim):
    H, D, A = hidden_dim, state_dim, action_dim
    k_lstm = 1.0 / np.sqrt(H)

    def uni(key, shape, k):
        return jax.random.uniform(key, shape, jnp.float32, -k, k)

    keys = jax.random.split(key, 14)
    params = {}
    params["lstm0_wih"] = uni(keys[0], (4 * H, D), k_lstm)
    params["lstm0_whh"] = uni(keys[1], (4 * H, H), k_lstm)
    params["lstm0_bih"] = uni(keys[2], (4 * H,), k_lstm)
    params["lstm0_bhh"] = uni(keys[3], (4 * H,), k_lstm)
    params["lstm2_wih"] = uni(keys[4], (4 * H, D), k_lstm)
    params["lstm2_whh"] = uni(keys[5], (4 * H, H), k_lstm)
    params["lstm2_bih"] = uni(keys[6], (4 * H,), k_lstm)
    params["lstm2_bhh"] = uni(keys[7], (4 * H,), k_lstm)
    params["fc1_w"] = uni(keys[8], (H, 2 * H), 1.0 / np.sqrt(2 * H))
    params["fc1_b"] = uni(keys[9], (H,), 1.0 / np.sqrt(2 * H))
    params["fc2_w"] = uni(keys[10], (H, H), 1.0 / np.sqrt(H))
    params["fc2_b"] = uni(keys[11], (H,), 1.0 / np.sqrt(H))
    params["out_w"] = uni(keys[12], (A * A, H), 1.0 / np.sqrt(H))
    params["out_b"] = uni(keys[13], (A * A,), 1.0 / np.sqrt(H))
    return params


def prepare_kernel_params(params, hidden_dim, action_dim):
    """One-time conversion of PyTorch-layout params into the two packed,
    right-multiply, gate-permuted, 0.5-prescaled kernel bundles."""
    H, A = hidden_dim, action_dim
    assert H % 8 == 0, "hidden_dim must be a multiple of 8 for the packed layout"
    D = params["lstm0_wih"].shape[1]
    H2, G, D2 = 2 * H, 8 * H, 2 * D
    R_IH = _round_up(D2, 8)
    L = max(128, _round_up(A * A, 128))

    # Gate order [i, f, g, o] (PyTorch). i/f/o pre-activations carry a 0.5
    # scale so the kernel recovers sigmoid(z) = 0.5*tanh(z/2) + 0.5 from a
    # single tanh over all gate lanes.
    gate_scale = (0.5, 0.5, 1.0, 0.5)

    def place(w_t, idx):
        # w_t: (K, 4H), torch gate order along columns. Returns (K, 8H) with
        # columns at [i0 i2 | f0 f2 | g0 g2 | o0 o2] for lstm `idx` in {0,1}.
        w_t = np.asarray(w_t, np.float32)
        K = w_t.shape[0]
        out = np.zeros((K, G), np.float32)
        for g in range(4):
            out[:, (2 * g + idx) * H:(2 * g + idx + 1) * H] = (
                gate_scale[g] * w_t[:, g * H:(g + 1) * H])
        return out

    # ---- LSTM bundle: [ wih (rows 0:2D) | whh (rows R_IH:R_IH+2H) | bias ] --
    lstm_bundle = np.zeros((R_IH + H2 + 8, G), np.float32)
    lstm_bundle[0:D, :] = place(np.asarray(params["lstm0_wih"]).T, 0)
    lstm_bundle[D:D2, :] = place(np.asarray(params["lstm2_wih"]).T, 1)
    lstm_bundle[R_IH:R_IH + H, :] = place(np.asarray(params["lstm0_whh"]).T, 0)
    lstm_bundle[R_IH + H:R_IH + H2, :] = place(
        np.asarray(params["lstm2_whh"]).T, 1)
    b0 = np.asarray(params["lstm0_bih"]) + np.asarray(params["lstm0_bhh"])
    b2 = np.asarray(params["lstm2_bih"]) + np.asarray(params["lstm2_bhh"])
    lstm_bundle[R_IH + H2, :] = (place(b0.reshape(1, 4 * H), 0)
                                 + place(b2.reshape(1, 4 * H), 1))[0]

    # ---- MLP bundle: everything zero-padded to L (=128) lanes ---------------
    mlp_bundle = np.zeros((H2 + 2 * L + 8, L), np.float32)
    mlp_bundle[0:H2, 0:H] = np.asarray(params["fc1_w"]).T
    mlp_bundle[H2:H2 + H, 0:H] = np.asarray(params["fc2_w"]).T
    mlp_bundle[H2 + L:H2 + L + H, 0:A * A] = np.asarray(params["out_w"]).T
    mlp_bundle[H2 + 2 * L + 0, 0:H] = np.asarray(params["fc1_b"])
    mlp_bundle[H2 + 2 * L + 1, 0:H] = np.asarray(params["fc2_b"])
    mlp_bundle[H2 + 2 * L + 2, 0:A * A] = np.asarray(params["out_b"])

    return {
        "lstm_bundle": jnp.asarray(lstm_bundle),
        "mlp_bundle": jnp.asarray(mlp_bundle),
    }


# ----------------------------------------------------------------------------
# Full forward (matches JointDQNLSTM.forward with h0=None, h2=None).
# ----------------------------------------------------------------------------
@functools.partial(jax.jit, static_argnames=("hidden_dim", "action_dim"))
def joint_dqn_lstm_forward(kparams, seq0, seq2, hidden_dim, action_dim):
    H, A = hidden_dim, action_dim
    B, T, D = seq0.shape
    BP = max(8, _round_up(B, 8))          # pad batch to full sublane tiles
    G = 8 * H
    L = kparams["mlp_bundle"].shape[1]

    # Time-major, feature-concatenated, batch-padded input: (T*BP, 2D).
    # These few tiny ops fuse inside this jit executable.
    x = jnp.concatenate([seq0, seq2], axis=-1).astype(jnp.float32)    # (B,T,2D)
    x = jnp.swapaxes(x, 0, 1)                                          # (T,B,2D)
    if BP > B:
        x = jnp.pad(x, ((0, 0), (0, BP - B), (0, 0)))                  # (T,BP,2D)
    x = x.reshape(T * BP, 2 * D)

    out = pl.pallas_call(
        _make_fused_kernel(T, BP, H, D, L),
        out_shape=jax.ShapeDtypeStruct((BP, 4 * H + L), jnp.float32),
        # TODO(synk): for large T*BP, chunk the hoisted projection instead of
        # one (T*BP, 8H) scratch (v7x has only 64 MiB physical VMEM).
        scratch_shapes=[pltpu.VMEM((T * BP, G), jnp.float32)],
    )(x, kparams["lstm_bundle"], kparams["mlp_bundle"])

    h0 = out[:B, 0 * H:1 * H]
    h2 = out[:B, 1 * H:2 * H]
    c0 = out[:B, 2 * H:3 * H]
    c2 = out[:B, 3 * H:4 * H]
    q = out[:B, 4 * H:4 * H + A * A].reshape(B, A, A)

    # PyTorch nn.LSTM returns hidden states shaped (num_layers, B, H).
    return q, (h0[None], c0[None]), (h2[None], c2[None])


# ----------------------------------------------------------------------------
# Pure-JAX reference (for correctness check only).
# ----------------------------------------------------------------------------
def _ref_lstm(seq, wih, whh, bih, bhh, H):
    B = seq.shape[0]
    h = jnp.zeros((B, H), jnp.float32)
    c = jnp.zeros((B, H), jnp.float32)

    def step(carry, x_t):
        h, c = carry
        gates = x_t @ wih.T + bih + h @ whh.T + bhh
        i = jax.nn.sigmoid(gates[:, 0 * H:1 * H])
        f = jax.nn.sigmoid(gates[:, 1 * H:2 * H])
        g = jnp.tanh(gates[:, 2 * H:3 * H])
        o = jax.nn.sigmoid(gates[:, 3 * H:4 * H])
        c = f * c + i * g
        h = o * jnp.tanh(c)
        return (h, c), None

    (h, c), _ = jax.lax.scan(step, (h, c), jnp.transpose(seq, (1, 0, 2)))
    return h, c


def _ref_forward(params, seq0, seq2, H, A):
    h0, c0 = _ref_lstm(seq0, params["lstm0_wih"], params["lstm0_whh"],
                       params["lstm0_bih"], params["lstm0_bhh"], H)
    h2, c2 = _ref_lstm(seq2, params["lstm2_wih"], params["lstm2_whh"],
                       params["lstm2_bih"], params["lstm2_bhh"], H)
    x = jnp.concatenate([h0, h2], axis=-1)
    x = jax.nn.relu(x @ params["fc1_w"].T + params["fc1_b"])
    x = jax.nn.relu(x @ params["fc2_w"].T + params["fc2_b"])
    q = x @ params["out_w"].T + params["out_b"]
    return q.reshape(-1, A, A), (h0[None], c0[None]), (h2[None], c2[None])


if __name__ == "__main__":
    B, T, D, H, A = 2, 8, 12, 32, 3

    key = jax.random.PRNGKey(0)
    kp, k0, k2 = jax.random.split(key, 3)
    params = init_params(kp, state_dim=D, hidden_dim=H, action_dim=A)
    kparams = prepare_kernel_params(params, hidden_dim=H, action_dim=A)
    seq0 = jax.random.normal(k0, (B, T, D), jnp.float32)
    seq2 = jax.random.normal(k2, (B, T, D), jnp.float32)

    q, h0_state, h2_state = joint_dqn_lstm_forward(
        kparams, seq0, seq2, hidden_dim=H, action_dim=A)
    jax.block_until_ready(q)
    jax.block_until_ready(h0_state)
    jax.block_until_ready(h2_state)

    q_ref, h0_ref, h2_ref = _ref_forward(params, seq0, seq2, H, A)
    np.testing.assert_allclose(np.asarray(q), np.asarray(q_ref),
                               rtol=1e-4, atol=1e-4)
    np.testing.assert_allclose(np.asarray(h0_state[0]), np.asarray(h0_ref[0]),
                               rtol=1e-4, atol=1e-4)
    np.testing.assert_allclose(np.asarray(h0_state[1]), np.asarray(h0_ref[1]),
                               rtol=1e-4, atol=1e-4)
    np.testing.assert_allclose(np.asarray(h2_state[0]), np.asarray(h2_ref[0]),
                               rtol=1e-4, atol=1e-4)
    np.testing.assert_allclose(np.asarray(h2_state[1]), np.asarray(h2_ref[1]),
                               rtol=1e-4, atol=1e-4)

    assert q.shape == (B, A, A)
    print("KERNEL_OK")
</pallas_src>

<mosaic_0001>
module attributes {stable_mosaic.version = 11 : i64} {
  func.func @kernel(%arg0: memref<64x24xf32, #tpu.memory_space<vmem>>, %arg1: memref<96x256xf32, #tpu.memory_space<vmem>>, %arg2: memref<328x128xf32, #tpu.memory_space<vmem>>, %arg3: memref<8x256xf32, #tpu.memory_space<vmem>>, %arg4: memref<64x256xf32, #tpu.memory_space<vmem>>) attributes {dimension_semantics = [], scalar_prefetch = 0 : i64, scratch_operands = 1 : i64, tpu.core_type = #tpu.core_type<tc>} {
    %c0 = arith.constant 0 : index
    %c0_0 = arith.constant 0 : index
    %0 = vector.load %arg1[%c0, %c0_0] : memref<96x256xf32, #tpu.memory_space<vmem>>, vector<24x256xf32>
    %c24 = arith.constant 24 : index
    %c0_1 = arith.constant 0 : index
    %1 = vector.load %arg1[%c24, %c0_1] : memref<96x256xf32, #tpu.memory_space<vmem>>, vector<64x256xf32>
    %c88 = arith.constant 88 : index
    %c0_2 = arith.constant 0 : index
    %2 = vector.load %arg1[%c88, %c0_2] : memref<96x256xf32, #tpu.memory_space<vmem>>, vector<1x256xf32>
    %c0_3 = arith.constant 0 : index
    %c0_4 = arith.constant 0 : index
    %3 = vector.load %arg2[%c0_3, %c0_4] : memref<328x128xf32, #tpu.memory_space<vmem>>, vector<64x128xf32>
    %c64 = arith.constant 64 : index
    %c0_5 = arith.constant 0 : index
    %4 = vector.load %arg2[%c64, %c0_5] : memref<328x128xf32, #tpu.memory_space<vmem>>, vector<128x128xf32>
    %c192 = arith.constant 192 : index
    %c0_6 = arith.constant 0 : index
    %5 = vector.load %arg2[%c192, %c0_6] : memref<328x128xf32, #tpu.memory_space<vmem>>, vector<128x128xf32>
    %c320 = arith.constant 320 : index
    %c0_7 = arith.constant 0 : index
    %6 = vector.load %arg2[%c320, %c0_7] : memref<328x128xf32, #tpu.memory_space<vmem>>, vector<8x128xf32>
    %7 = vector.extract_strided_slice %6 {offsets = [0, 0], sizes = [1, 128], strides = [1, 1]} : vector<8x128xf32> to vector<1x128xf32>
    %8 = vector.extract_strided_slice %6 {offsets = [1, 0], sizes = [1, 128], strides = [1, 1]} : vector<8x128xf32> to vector<1x128xf32>
    %9 = vector.extract_strided_slice %6 {offsets = [2, 0], sizes = [1, 128], strides = [1, 1]} : vector<8x128xf32> to vector<1x128xf32>
    %c0_8 = arith.constant 0 : index
    %c0_9 = arith.constant 0 : index
    %10 = vector.load %arg0[%c0_8, %c0_9] : memref<64x24xf32, #tpu.memory_space<vmem>>, vector<64x24xf32>
    %cst = arith.constant dense<0.000000e+00> : vector<64x256xf32>
    %11 = tpu.matmul %10, %0, %cst {dimension_numbers = #tpu.dot_dimension_numbers<[1], [0], [0], [1], [0, 0, 1, 1], [], []>} : vector<64x24xf32>, vector<24x256xf32>, vector<64x256xf32> -> vector<64x256xf32>
    %12 = vector.broadcast %2 : vector<1x256xf32> to vector<64x256xf32>
    %13 = arith.addf %11, %12 : vector<64x256xf32>
    %c0_10 = arith.constant 0 : index
    %c0_11 = arith.constant 0 : index
    %14 = vector.load %arg4[%c0_10, %c0_11] : memref<64x256xf32, #tpu.memory_space<vmem>>, vector<64x256xf32>
    tpu.vector_store %arg4[%c0_10, %c0_11], %13 {strides = array<i32>} : memref<64x256xf32, #tpu.memory_space<vmem>>, vector<64x256xf32>,
    %cst_12 = arith.constant 0.000000e+00 : f32
    %15 = vector.broadcast %cst_12 : f32 to vector<8x64xf32>
    %cst_13 = arith.constant 0.000000e+00 : f32
    %16 = vector.broadcast %cst_13 : f32 to vector<8x64xf32>
    %c0_14 = arith.constant 0 : index
    %c0_15 = arith.constant 0 : index
    %17 = vector.load %arg4[%c0_14, %c0_15] : memref<64x256xf32, #tpu.memory_space<vmem>>, vector<8x256xf32>
    %cst_16 = arith.constant dense<0.000000e+00> : vector<8x256xf32>
    %18 = tpu.matmul %15, %1, %cst_16 {dimension_numbers = #tpu.dot_dimension_numbers<[1], [0], [0], [1], [0, 0, 1, 1], [], []>} : vector<8x64xf32>, vector<64x256xf32>, vector<8x256xf32> -> vector<8x256xf32>
    %19 = arith.addf %18, %17 : vector<8x256xf32>
    %20 = math.tanh %19 : vector<8x256xf32>
    %cst_17 = arith.constant 5.000000e-01 : f32
    %21 = vector.broadcast %cst_17 : f32 to vector<8x256xf32>
    %22 = arith.mulf %21, %20 : vector<8x256xf32>
    %cst_18 = arith.constant 5.000000e-01 : f32
    %23 = vector.broadcast %cst_18 : f32 to vector<8x256xf32>
    %24 = arith.addf %22, %23 : vector<8x256xf32>
    %25 = vector.extract_strided_slice %24 {offsets = [0, 0], sizes = [8, 64], strides = [1, 1]} : vector<8x256xf32> to vector<8x64xf32>
    %26 = vector.extract_strided_slice %24 {offsets = [0, 64], sizes = [8, 64], strides = [1, 1]} : vector<8x256xf32> to vector<8x64xf32>
    %27 = vector.extract_strided_slice %20 {offsets = [0, 128], sizes = [8, 64], strides = [1, 1]} : vector<8x256xf32> to vector<8x64xf32>
    %28 = vector.extract_strided_slice %24 {offsets = [0, 192], sizes = [8, 64], strides = [1, 1]} : vector<8x256xf32> to vector<8x64xf32>
    %29 = arith.mulf %26, %16 : vector<8x64xf32>
    %30 = arith.mulf %25, %27 : vector<8x64xf32>
    %31 = arith.addf %29, %30 : vector<8x64xf32>
    %32 = math.tanh %31 : vector<8x64xf32>
    %33 = arith.mulf %28, %32 : vector<8x64xf32>
    %c8 = arith.constant 8 : index
    %c0_19 = arith.constant 0 : index
    %34 = vector.load %arg4[%c8, %c0_19] : memref<64x256xf32, #tpu.memory_space<vmem>>, vector<8x256xf32>
    %cst_20 = arith.constant dense<0.000000e+00> : vector<8x256xf32>
    %35 = tpu.matmul %33, %1, %cst_20 {dimension_numbers = #tpu.dot_dimension_numbers<[1], [0], [0], [1], [0, 0, 1, 1], [], []>} : vector<8x64xf32>, vector<64x256xf32>, vector<8x256xf32> -> vector<8x256xf32>
    %36 = arith.addf %35, %34 : vector<8x256xf32>
    %37 = math.tanh %36 : vector<8x256xf32>
    %cst_21 = arith.constant 5.000000e-01 : f32
    %38 = vector.broadcast %cst_21 : f32 to vector<8x256xf32>
    %39 = arith.mulf %38, %37 : vector<8x256xf32>
    %cst_22 = arith.constant 5.000000e-01 : f32
    %40 = vector.broadcast %cst_22 : f32 to vector<8x256xf32>
    %41 = arith.addf %39, %40 : vector<8x256xf32>
    %42 = vector.extract_strided_slice %41 {offsets = [0, 0], sizes = [8, 64], strides = [1, 1]} : vector<8x256xf32> to vector<8x64xf32>
    %43 = vector.extract_strided_slice %41 {offsets = [0, 64], sizes = [8, 64], strides = [1, 1]} : vector<8x256xf32> to vector<8x64xf32>
    %44 = vector.extract_strided_slice %37 {offsets = [0, 128], sizes = [8, 64], strides = [1, 1]} : vector<8x256xf32> to vector<8x64xf32>
    %45 = vector.extract_strided_slice %41 {offsets = [0, 192], sizes = [8, 64], strides = [1, 1]} : vector<8x256xf32> to vector<8x64xf32>
    %46 = arith.mulf %43, %31 : vector<8x64xf32>
    %47 = arith.mulf %42, %44 : vector<8x64xf32>
    %48 = arith.addf %46, %47 : vector<8x64xf32>
    %49 = math.tanh %48 : vector<8x64xf32>
    %50 = arith.mulf %45, %49 : vector<8x64xf32>
    %c16 = arith.constant 16 : index
    %c0_23 = arith.constant 0 : index
    %51 = vector.load %arg4[%c16, %c0_23] : memref<64x256xf32, #tpu.memory_space<vmem>>, vector<8x256xf32>
    %cst_24 = arith.constant dense<0.000000e+00> : vector<8x256xf32>
    %52 = tpu.matmul %50, %1, %cst_24 {dimension_numbers = #tpu.dot_dimension_numbers<[1], [0], [0], [1], [0, 0, 1, 1], [], []>} : vector<8x64xf32>, vector<64x256xf32>, vector<8x256xf32> -> vector<8x256xf32>
    %53 = arith.addf %52, %51 : vector<8x256xf32>
    %54 = math.tanh %53 : vector<8x256xf32>
    %cst_25 = arith.constant 5.000000e-01 : f32
    %55 = vector.broadcast %cst_25 : f32 to vector<8x256xf32>
    %56 = arith.mulf %55, %54 : vector<8x256xf32>
    %cst_26 = arith.constant 5.000000e-01 : f32
    %57 = vector.broadcast %cst_26 : f32 to vector<8x256xf32>
    %58 = arith.addf %56, %57 : vector<8x256xf32>
    %59 = vector.extract_strided_slice %58 {offsets = [0, 0], sizes = [8, 64], strides = [1, 1]} : vector<8x256xf32> to vector<8x64xf32>
    %60 = vector.extract_strided_slice %58 {offsets = [0, 64], sizes = [8, 64], strides = [1, 1]} : vector<8x256xf32> to vector<8x64xf32>
    %61 = vector.extract_strided_slice %54 {offsets = [0, 128], sizes = [8, 64], strides = [1, 1]} : vector<8x256xf32> to vector<8x64xf32>
    %62 = vector.extract_strided_slice %58 {offsets = [0, 192], sizes = [8, 64], strides = [1, 1]} : vector<8x256xf32> to vector<8x64xf32>
    %63 = arith.mulf %60, %48 : vector<8x64xf32>
    %64 = arith.mulf %59, %61 : vector<8x64xf32>
    %65 = arith.addf %63, %64 : vector<8x64xf32>
    %66 = math.tanh %65 : vector<8x64xf32>
    %67 = arith.mulf %62, %66 : vector<8x64xf32>
    %c24_27 = arith.constant 24 : index
    %c0_28 = arith.constant 0 : index
    %68 = vector.load %arg4[%c24_27, %c0_28] : memref<64x256xf32, #tpu.memory_space<vmem>>, vector<8x256xf32>
    %cst_29 = arith.constant dense<0.000000e+00> : vector<8x256xf32>
    %69 = tpu.matmul %67, %1, %cst_29 {dimension_numbers = #tpu.dot_dimension_numbers<[1], [0], [0], [1], [0, 0, 1, 1], [], []>} : vector<8x64xf32>, vector<64x256xf32>, vector<8x256xf32> -> vector<8x256xf32>
    %70 = arith.addf %69, %68 : vector<8x256xf32>
    %71 = math.tanh %70 : vector<8x256xf32>
    %cst_30 = arith.constant 5.000000e-01 : f32
    %72 = vector.broadcast %cst_30 : f32 to vector<8x256xf32>
    %73 = arith.mulf %72, %71 : vector<8x256xf32>
    %cst_31 = arith.constant 5.000000e-01 : f32
    %74 = vector.broadcast %cst_31 : f32 to vector<8x256xf32>
    %75 = arith.addf %73, %74 : vector<8x256xf32>
    %76 = vector.extract_strided_slice %75 {offsets = [0, 0], sizes = [8, 64], strides = [1, 1]} : vector<8x256xf32> to vector<8x64xf32>
    %77 = vector.extract_strided_slice %75 {offsets = [0, 64], sizes = [8, 64], strides = [1, 1]} : vector<8x256xf32> to vector<8x64xf32>
    %78 = vector.extract_strided_slice %71 {offsets = [0, 128], sizes = [8, 64], strides = [1, 1]} : vector<8x256xf32> to vector<8x64xf32>
    %79 = vector.extract_strided_slice %75 {offsets = [0, 192], sizes = [8, 64], strides = [1, 1]} : vector<8x256xf32> to vector<8x64xf32>
    %80 = arith.mulf %77, %65 : vector<8x64xf32>
    %81 = arith.mulf %76, %78 : vector<8x64xf32>
    %82 = arith.addf %80, %81 : vector<8x64xf32>
    %83 = math.tanh %82 : vector<8x64xf32>
    %84 = arith.mulf %79, %83 : vector<8x64xf32>
    %c32 = arith.constant 32 : index
    %c0_32 = arith.constant 0 : index
    %85 = vector.load %arg4[%c32, %c0_32] : memref<64x256xf32, #tpu.memory_space<vmem>>, vector<8x256xf32>
    %cst_33 = arith.constant dense<0.000000e+00> : vector<8x256xf32>
    %86 = tpu.matmul %84, %1, %cst_33 {dimension_numbers = #tpu.dot_dimension_numbers<[1], [0], [0], [1], [0, 0, 1, 1], [], []>} : vector<8x64xf32>, vector<64x256xf32>, vector<8x256xf32> -> vector<8x256xf32>
    %87 = arith.addf %86, %85 : vector<8x256xf32>
    %88 = math.tanh %87 : vector<8x256xf32>
    %cst_34 = arith.constant 5.000000e-01 : f32
    %89 = vector.broadcast %cst_34 : f32 to vector<8x256xf32>
    %90 = arith.mulf %89, %88 : vector<8x256xf32>
    %cst_35 = arith.constant 5.000000e-01 : f32
    %91 = vector.broadcast %cst_35 : f32 to vector<8x256xf32>
    %92 = arith.addf %90, %91 : vector<8x256xf32>
    %93 = vector.extract_strided_slice %92 {offsets = [0, 0], sizes = [8, 64], strides = [1, 1]} : vector<8x256xf32> to vector<8x64xf32>
    %94 = vector.extract_strided_slice %92 {offsets = [0, 64], sizes = [8, 64], strides = [1, 1]} : vector<8x256xf32> to vector<8x64xf32>
    %95 = vector.extract_strided_slice %88 {offsets = [0, 128], sizes = [8, 64], strides = [1, 1]} : vector<8x256xf32> to vector<8x64xf32>
    %96 = vector.extract_strided_slice %92 {offsets = [0, 192], sizes = [8, 64], strides = [1, 1]} : vector<8x256xf32> to vector<8x64xf32>
    %97 = arith.mulf %94, %82 : vector<8x64xf32>
    %98 = arith.mulf %93, %95 : vector<8x64xf32>
    %99 = arith.addf %97, %98 : vector<8x64xf32>
    %100 = math.tanh %99 : vector<8x64xf32>
    %101 = arith.mulf %96, %100 : vector<8x64xf32>
    %c40 = arith.constant 40 : index
    %c0_36 = arith.constant 0 : index
    %102 = vector.load %arg4[%c40, %c0_36] : memref<64x256xf32, #tpu.memory_space<vmem>>, vector<8x256xf32>
    %cst_37 = arith.constant dense<0.000000e+00> : vector<8x256xf32>
    %103 = tpu.matmul %101, %1, %cst_37 {dimension_numbers = #tpu.dot_dimension_numbers<[1], [0], [0], [1], [0, 0, 1, 1], [], []>} : vector<8x64xf32>, vector<64x256xf32>, vector<8x256xf32> -> vector<8x256xf32>
    %104 = arith.addf %103, %102 : vector<8x256xf32>
    %105 = math.tanh %104 : vector<8x256xf32>
    %cst_38 = arith.constant 5.000000e-01 : f32
    %106 = vector.broadcast %cst_38 : f32 to vector<8x256xf32>
    %107 = arith.mulf %106, %105 : vector<8x256xf32>
    %cst_39 = arith.constant 5.000000e-01 : f32
    %108 = vector.broadcast %cst_39 : f32 to vector<8x256xf32>
    %109 = arith.addf %107, %108 : vector<8x256xf32>
    %110 = vector.extract_strided_slice %109 {offsets = [0, 0], sizes = [8, 64], strides = [1, 1]} : vector<8x256xf32> to vector<8x64xf32>
    %111 = vector.extract_strided_slice %109 {offsets = [0, 64], sizes = [8, 64], strides = [1, 1]} : vector<8x256xf32> to vector<8x64xf32>
    %112 = vector.extract_strided_slice %105 {offsets = [0, 128], sizes = [8, 64], strides = [1, 1]} : vector<8x256xf32> to vector<8x64xf32>
    %113 = vector.extract_strided_slice %109 {offsets = [0, 192], sizes = [8, 64], strides = [1, 1]} : vector<8x256xf32> to vector<8x64xf32>
    %114 = arith.mulf %111, %99 : vector<8x64xf32>
    %115 = arith.mulf %110, %112 : vector<8x64xf32>
    %116 = arith.addf %114, %115 : vector<8x64xf32>
    %117 = math.tanh %116 : vector<8x64xf32>
    %118 = arith.mulf %113, %117 : vector<8x64xf32>
    %c48 = arith.constant 48 : index
    %c0_40 = arith.constant 0 : index
    %119 = vector.load %arg4[%c48, %c0_40] : memref<64x256xf32, #tpu.memory_space<vmem>>, vector<8x256xf32>
    %cst_41 = arith.constant dense<0.000000e+00> : vector<8x256xf32>
    %120 = tpu.matmul %118, %1, %cst_41 {dimension_numbers = #tpu.dot_dimension_numbers<[1], [0], [0], [1], [0, 0, 1, 1], [], []>} : vector<8x64xf32>, vector<64x256xf32>, vector<8x256xf32> -> vector<8x256xf32>
    %121 = arith.addf %120, %119 : vector<8x256xf32>
    %122 = math.tanh %121 : vector<8x256xf32>
    %cst_42 = arith.constant 5.000000e-01 : f32
    %123 = vector.broadcast %cst_42 : f32 to vector<8x256xf32>
    %124 = arith.mulf %123, %122 : vector<8x256xf32>
    %cst_43 = arith.constant 5.000000e-01 : f32
    %125 = vector.broadcast %cst_43 : f32 to vector<8x256xf32>
    %126 = arith.addf %124, %125 : vector<8x256xf32>
    %127 = vector.extract_strided_slice %126 {offsets = [0, 0], sizes = [8, 64], strides = [1, 1]} : vector<8x256xf32> to vector<8x64xf32>
    %128 = vector.extract_strided_slice %126 {offsets = [0, 64], sizes = [8, 64], strides = [1, 1]} : vector<8x256xf32> to vector<8x64xf32>
    %129 = vector.extract_strided_slice %122 {offsets = [0, 128], sizes = [8, 64], strides = [1, 1]} : vector<8x256xf32> to vector<8x64xf32>
    %130 = vector.extract_strided_slice %126 {offsets = [0, 192], sizes = [8, 64], strides = [1, 1]} : vector<8x256xf32> to vector<8x64xf32>
    %131 = arith.mulf %128, %116 : vector<8x64xf32>
    %132 = arith.mulf %127, %129 : vector<8x64xf32>
    %133 = arith.addf %131, %132 : vector<8x64xf32>
    %134 = math.tanh %133 : vector<8x64xf32>
    %135 = arith.mulf %130, %134 : vector<8x64xf32>
    %c56 = arith.constant 56 : index
    %c0_44 = arith.constant 0 : index
    %136 = vector.load %arg4[%c56, %c0_44] : memref<64x256xf32, #tpu.memory_space<vmem>>, vector<8x256xf32>
    %cst_45 = arith.constant dense<0.000000e+00> : vector<8x256xf32>
    %137 = tpu.matmul %135, %1, %cst_45 {dimension_numbers = #tpu.dot_dimension_numbers<[1], [0], [0], [1], [0, 0, 1, 1], [], []>} : vector<8x64xf32>, vector<64x256xf32>, vector<8x256xf32> -> vector<8x256xf32>
    %138 = arith.addf %137, %136 : vector<8x256xf32>
    %139 = math.tanh %138 : vector<8x256xf32>
    %cst_46 = arith.constant 5.000000e-01 : f32
    %140 = vector.broadcast %cst_46 : f32 to vector<8x256xf32>
    %141 = arith.mulf %140, %139 : vector<8x256xf32>
    %cst_47 = arith.constant 5.000000e-01 : f32
    %142 = vector.broadcast %cst_47 : f32 to vector<8x256xf32>
    %143 = arith.addf %141, %142 : vector<8x256xf32>
    %144 = vector.extract_strided_slice %143 {offsets = [0, 0], sizes = [8, 64], strides = [1, 1]} : vector<8x256xf32> to vector<8x64xf32>
    %145 = vector.extract_strided_slice %143 {offsets = [0, 64], sizes = [8, 64], strides = [1, 1]} : vector<8x256xf32> to vector<8x64xf32>
    %146 = vector.extract_strided_slice %139 {offsets = [0, 128], sizes = [8, 64], strides = [1, 1]} : vector<8x256xf32> to vector<8x64xf32>
    %147 = vector.extract_strided_slice %143 {offsets = [0, 192], sizes = [8, 64], strides = [1, 1]} : vector<8x256xf32> to vector<8x64xf32>
    %148 = arith.mulf %145, %133 : vector<8x64xf32>
    %149 = arith.mulf %144, %146 : vector<8x64xf32>
    %150 = arith.addf %148, %149 : vector<8x64xf32>
    %151 = math.tanh %150 : vector<8x64xf32>
    %152 = arith.mulf %147, %151 : vector<8x64xf32>
    %cst_48 = arith.constant dense<0.000000e+00> : vector<8x128xf32>
    %153 = tpu.matmul %152, %3, %cst_48 {dimension_numbers = #tpu.dot_dimension_numbers<[1], [0], [0], [1], [0, 0, 1, 1], [], []>} : vector<8x64xf32>, vector<64x128xf32>, vector<8x128xf32> -> vector<8x128xf32>
    %154 = vector.broadcast %7 : vector<1x128xf32> to vector<8x128xf32>
    %155 = arith.addf %153, %154 : vector<8x128xf32>
    %cst_49 = arith.constant 0.000000e+00 : f32
    %156 = vector.broadcast %cst_49 : f32 to vector<8x128xf32>
    %157 = arith.maximumf %155, %156 : vector<8x128xf32>
    %cst_50 = arith.constant dense<0.000000e+00> : vector<8x128xf32>
    %158 = tpu.matmul %157, %4, %cst_50 {dimension_numbers = #tpu.dot_dimension_numbers<[1], [0], [0], [1], [0, 0, 1, 1], [], []>} : vector<8x128xf32>, vector<128x128xf32>, vector<8x128xf32> -> vector<8x128xf32>
    %159 = vector.broadcast %8 : vector<1x128xf32> to vector<8x128xf32>
    %160 = arith.addf %158, %159 : vector<8x128xf32>
    %cst_51 = arith.constant 0.000000e+00 : f32
    %161 = vector.broadcast %cst_51 : f32 to vector<8x128xf32>
    %162 = arith.maximumf %160, %161 : vector<8x128xf32>
    %cst_52 = arith.constant dense<0.000000e+00> : vector<8x128xf32>
    %163 = tpu.matmul %162, %5, %cst_52 {dimension_numbers = #tpu.dot_dimension_numbers<[1], [0], [0], [1], [0, 0, 1, 1], [], []>} : vector<8x128xf32>, vector<128x128xf32>, vector<8x128xf32> -> vector<8x128xf32>
    %164 = vector.broadcast %9 : vector<1x128xf32> to vector<8x128xf32>
    %165 = arith.addf %163, %164 : vector<8x128xf32>
    %166 = tpu.concatenate %152, %150, %165 in 1 : vector<8x64xf32>, vector<8x64xf32>, vector<8x128xf32> -> vector<8x256xf32>
    %c0_53 = arith.constant 0 : index
    %c0_54 = arith.constant 0 : index
    %167 = vector.load %arg3[%c0_53, %c0_54] : memref<8x256xf32, #tpu.memory_space<vmem>>, vector<8x256xf32>
    tpu.vector_store %arg3[%c0_53, %c0_54], %166 {strides = array<i32>} : memref<8x256xf32, #tpu.memory_space<vmem>>, vector<8x256xf32>,
    return
  }
}

</mosaic_0001>

<bundles_post_ra>
// kernel: joint_dqn_lstm_forward.1
= control target key start
LH: loop header
LB: loop body
LE: loop exit
PB: predicated region body
PF: predicated region fallthrough
CT: control target
= control target key end

     0   :  { %8 = vsyncpa [#allocation4], 0  ;;  %s1259_s0 = inlined_call_operand.vmem [shape: f32[64,24], index: 0, kind: input, shape index: {}]   ;;  %s1260_s1 = inlined_call_operand.hbm [shape: f32[96,256], index: 1, kind: input, shape index: {}]   ;;  %s1261_s2 = inlined_call_operand.hbm [shape: f32[328,128], index: 2, kind: input, shape index: {}]   ;;  %s1262_s3 = inlined_call_operand.vmem [shape: f32[8,256], index: 3, kind: output, shape index: {}]  }
   0x1   :  { %s16_s14 = sshll.u32 %s1260_s1, 4  ;;  %s17_s14 = int_to_ptr.hbm [resolvable:$true] %s16_s14 }
   0x2   :  { %9 = vsyncpa [#allocation6], 0  ;;  %s961_s15 = smov [#allocation3]   ;;  %s29_s19 = sshll.u32 %s1261_s2, 4  ;;  %s30_s19 = int_to_ptr.hbm [resolvable:$true] %s29_s19 }
   0x3   :  { %s18_s16 = sshll.u32 %s961_s15, 4  ;;  %s962_s20 = smov 256   ;;  %s19_s16 = int_to_ptr.vmem [resolvable:$true] %s18_s16 }
   0x4   :  { %s963_s21 = smov 16   ;;  %s964_s22 = smov [#allocation5]  }
   0x5   :  { %24 = dma.hbm_to_vmem [thread:$0]  %s17_s14, 3072, %s19_s16, [#allocation4], %s962_s20, %s962_s20, %s963_s21  }
   0x6   :  { %s31_s23 = sshll.u32 %s964_s22, 4  ;;  %s965_s24 = smov 128   ;;  %s32_s23 = int_to_ptr.vmem [resolvable:$true] %s31_s23 }
   0x7   :  { %s966_s25 = smov 8  }
   0x8   :  { %37 = dma.hbm_to_vmem [thread:$0]  %s30_s19, 5248, %s32_s23, [#allocation6], %s965_s24, %s965_s24, %s966_s25  }
   0x9   :  { %957 = dma.done.wait [#allocation4], 3072  }
   0xa   :  { %958 = vsyncadd [#allocation4], 4294964224 }
   0xb   :  { %959 = dma.done.wait [#allocation6], 5248  }
   0xc   :  { %960 = vsyncadd [#allocation6], 4294962048  ;;  %v995_v0 = vld [vmem:[#allocation3 + $0xa0] sm:$0xff]  ;;  %v997_v1 = vld [vmem:[#allocation3 + $0x90] sm:$0xff]  ;;  %vm124_vm0 = vcmask 195584   ;;  %v967_v18 = vmov 0.0  }
   0xd   :  { %261 = vmatpush.msra.mxu3 %v995_v0  ;;  %323 = vmatpush.msra.mxu2 %v995_v0  ;;  %v1001_v2 = vld [vmem:[#allocation3 + $0x80] sm:$0xff]  ;;  %v1005_v4 = vld [vmem:[#allocation3 + $0x70] sm:$0xff]  ;;  %v51_v9 = vld [vmem:[#allocation3 + $0x28] sm:$0xff]  ;;  %s968_s26 = smov 64   ;;  %vm249_vm1 = vcmask 523264  }
   0xe   :  { %v50_v3 = vld [vmem:[#allocation3 + $0x20] sm:$0xff]  ;;  %v48_v5 = vld [vmem:[#allocation3 + $0x10] sm:$0xff]  ;;  %203 = vmatpush.msra.mxu1 %v51_v9  ;;  %v49_v10 = vld [vmem:[#allocation3 + $0x18] sm:$0xff] }
   0xf   :  { %262 = vmatpush.msra.mxu3 %v997_v1  ;;  %324 = vmatpush.msra.mxu2 %v997_v1  ;;  %v46_v6 = vld [vmem:[#allocation3] sm:$0xff]  ;;  %v1015_v11 = vld [vmem:[#allocation3 + $0x50] sm:$0xff]  ;;  %v47_v12 = vld [vmem:[#allocation3 + $0x8] sm:$0xff] }
  0x10   :  { %162 = vmatpush.msra.mxu0 %v50_v3  ;;  %v1009_v7 = vld [vmem:[#allocation3 + $0x60] sm:$0xff]  ;;  %204 = vmatpush.msra.mxu1 %v49_v10  ;;  %v1025_v14 = vld [vmem:[#allocation3 + $0x30] sm:$0xff]  ;;  %v1029_v15 = vld [vmem:[#allocation3 + $0xa8] sm:$0xff] }
  0x11   :  { %263 = vmatpush.msra.mxu3 %v1001_v2  ;;  %325 = vmatpush.msra.mxu2 %v1001_v2  ;;  %v111_v8 = vld [vmem:[%s1259_s0] sm:$0xff]  ;;  %v1035_v16 = vld [vmem:[#allocation3 + $0x98] sm:$0xff]  ;;  %v1040_v17 = vld [vmem:[#allocation3 + $0x88] sm:$0xff] }
  0x12   :  { %163 = vmatpush.msra.mxu0 %v48_v5  ;;  %v1020_v13 = vld [vmem:[#allocation3 + $0x40] sm:$0xff]  ;;  %205 = vmatpush.msra.mxu1 %v47_v12  ;;  %v1045_v19 = vld [vmem:[#allocation3 + $0x78] sm:$0xff]  ;;  %v1051_v20 = vld [vmem:[#allocation3 + $0x68] sm:$0xff] }
  0x13   :  { %264 = vmatpush.msra.mxu3 %v1005_v4  ;;  %326 = vmatpush.msra.mxu2 %v1005_v4  ;;  %v1057_v21 = vld [vmem:[#allocation3 + $0x58] sm:$0xff]  ;;  %v1063_v22 = vld [vmem:[#allocation3 + $0x48] sm:$0xff]  ;;  %v113_v10 = vld [vmem:[%s1259_s0 + $0x10] sm:$0xff] }
  0x14   :  { %164 = vmatpush.msra.mxu0 %v46_v6  ;;  %830 = vmatmul.msk.f32.vlgmr.msra.gmra.mxu1 %vm124_vm0, %v111_v8  ;;  %v1069_v23 = vld [vmem:[#allocation3 + $0x38] sm:$0xff]  ;;  %v112_v47 = vld [vmem:[%s1259_s0 + $0x8] sm:$0xff] }
  0x15   :  { %265 = vmatpush.msra.mxu3 %v1009_v7  ;;  %822 = vmatmul.msk.f32.vlgmr.msra.gmra.mxu0 %vm124_vm0, %v111_v8  ;;  %v69_v24 = vld [vmem:[#allocation3 + $0xb0] ss:$8 sm:$0x3] }
  0x16   :  { %327 = vmatpush.msra.mxu2 %v1009_v7  ;;  %509 = vmatpush.msrb.mxu0 %v995_v0  ;;  %v1112_v25 = vperm.slane %v69_v24, 0  ;;  %v1115_v30 = vperm.slane %v69_v24, 1 }
  0x17   :  { %266 = vmatpush.msra.mxu3 %v1015_v11  ;;  %529 = vmatpush.msrb.mxu1 %v1029_v15 }
  0x18   :  { %328 = vmatpush.msra.mxu2 %v1015_v11  ;;  %510 = vmatpush.msrb.mxu0 %v997_v1 }
  0x19   :  { %267 = vmatpush.msra.mxu3 %v1020_v13  ;;  %530 = vmatpush.msrb.mxu1 %v1035_v16 }
  0x1a   :  { %329 = vmatpush.msra.mxu2 %v1020_v13  ;;  %511 = vmatpush.msrb.mxu0 %v1001_v2 }
  0x1b   :  { %268 = vmatpush.msra.mxu3 %v1025_v14  ;;  %531 = vmatpush.msrb.mxu1 %v1040_v17 }
  0x1c   :  { %330 = vmatpush.msra.mxu2 %v1025_v14  ;;  %269 = vmatmul.f32.vlgmr.msra.gmra.mxu3 %v967_v18 }
  0x1d   :  { %281 = vmatpush.msrb.mxu3 %v1029_v15  ;;  %512 = vmatpush.msrb.mxu0 %v1005_v4 }
  0x1e   :  { %385 = vmatpush.msrb.mxu2 %v995_v0  ;;  %532 = vmatpush.msrb.mxu1 %v1045_v19 }
  0x1f   :  { %282 = vmatpush.msrb.mxu3 %v1035_v16  ;;  %513 = vmatpush.msrb.mxu0 %v1009_v7 }
  0x20   :  { %386 = vmatpush.msrb.mxu2 %v997_v1  ;;  %533 = vmatpush.msrb.mxu1 %v1051_v20 }
  0x21   :  { %283 = vmatpush.msrb.mxu3 %v1040_v17  ;;  %514 = vmatpush.msrb.mxu0 %v1015_v11 }
  0x22   :  { %387 = vmatpush.msrb.mxu2 %v1001_v2  ;;  %534 = vmatpush.msrb.mxu1 %v1057_v21 }
  0x23   :  { %284 = vmatpush.msrb.mxu3 %v1045_v19  ;;  %515 = vmatpush.msrb.mxu0 %v1020_v13 }
  0x24   :  { %388 = vmatpush.msrb.mxu2 %v1005_v4  ;;  %535 = vmatpush.msrb.mxu1 %v1063_v22 }
  0x25   :  { %285 = vmatpush.msrb.mxu3 %v1051_v20  ;;  %516 = vmatpush.msrb.mxu0 %v1025_v14 }
  0x26   :  { %389 = vmatpush.msrb.mxu2 %v1009_v7  ;;  %536 = vmatpush.msrb.mxu1 %v1069_v23 }
  0x27   :  { %286 = vmatpush.msrb.mxu3 %v1057_v21  ;;  %633 = vmatpush.msra.mxu0 %v995_v0 }
  0x28   :  { %390 = vmatpush.msrb.mxu2 %v1015_v11  ;;  %653 = vmatpush.msra.mxu1 %v1029_v15 }
  0x29   :  { %287 = vmatpush.msrb.mxu3 %v1063_v22  ;;  %634 = vmatpush.msra.mxu0 %v997_v1 }
  0x2a   :  { %391 = vmatpush.msrb.mxu2 %v1020_v13  ;;  %654 = vmatpush.msra.mxu1 %v1035_v16 }
  0x2b   :  { %288 = vmatpush.msrb.mxu3 %v1069_v23  ;;  %635 = vmatpush.msra.mxu0 %v1001_v2 }
  0x2c   :  { %289 = vmatmul.f32.vlgmr.msrb.gmra.mxu3 %v967_v18  ;;  %392 = vmatpush.msrb.mxu2 %v1025_v14 }
  0x2d   :  { %343 = vmatpush.msra.mxu3 %v1029_v15  ;;  %655 = vmatpush.msra.mxu1 %v1040_v17 }
  0x2e   :  { %636 = vmatpush.msra.mxu0 %v1005_v4  ;;  %831 = vmatmul.msk.f32.gmra.mxu1 %vm124_vm0, %v112_v47 }
  0x2f   :  { %344 = vmatpush.msra.mxu3 %v1035_v16  ;;  %656 = vmatpush.msra.mxu1 %v1045_v19 }
  0x30   :  { %637 = vmatpush.msra.mxu0 %v1009_v7 }
  0x31   :  { %345 = vmatpush.msra.mxu3 %v1040_v17  ;;  %657 = vmatpush.msra.mxu1 %v1051_v20 }
  0x32   :  { %638 = vmatpush.msra.mxu0 %v1015_v11 }
  0x33   :  { %346 = vmatpush.msra.mxu3 %v1045_v19  ;;  %658 = vmatpush.msra.mxu1 %v1057_v21 }
  0x34   :  { %639 = vmatpush.msra.mxu0 %v1020_v13 }
  0x35   :  { %347 = vmatpush.msra.mxu3 %v1051_v20  ;;  %659 = vmatpush.msra.mxu1 %v1063_v22 }
  0x36   :  { %640 = vmatpush.msra.mxu0 %v1025_v14  ;;  %832 = vmatmul.msk.f32.gmra.mxu1 %vm124_vm0, %v113_v10 }
  0x37   :  { %348 = vmatpush.msra.mxu3 %v1057_v21  ;;  %660 = vmatpush.msra.mxu1 %v1069_v23 }
  0x38   :  { %823 = vmatmul.msk.f32.gmra.mxu0 %vm124_vm0, %v112_v47 }
  0x39   :  { %349 = vmatpush.msra.mxu3 %v1063_v22 }
  0x3b   :  { %350 = vmatpush.msra.mxu3 %v1069_v23 }
  0x3d   :  { %405 = vmatpush.msrb.mxu3 %v1029_v15 }
  0x3f   :  { %406 = vmatpush.msrb.mxu3 %v1035_v16 }
  0x40   :  { %824 = vmatmul.msk.f32.gmra.mxu0 %vm124_vm0, %v113_v10 }
  0x41   :  { %407 = vmatpush.msrb.mxu3 %v1040_v17 }
  0x43   :  { %408 = vmatpush.msrb.mxu3 %v1045_v19 }
  0x45   :  { %409 = vmatpush.msrb.mxu3 %v1051_v20 }
  0x47   :  { %410 = vmatpush.msrb.mxu3 %v1057_v21 }
  0x49   :  { %411 = vmatpush.msrb.mxu3 %v1063_v22 }
  0x4b   :  { %412 = vmatpush.msrb.mxu3 %v1069_v23 }
  0x91   :  { %v207_v31 = vpop.f32.mrf.mxu1 }
  0x92   :  { %v166_v26 = vpop.f32.mrf.mxu0  ;;  %v208_v32 = vadd.f32 %v207_v31, %v1115_v30 }
  0x93   :  { %v167_v27 = vadd.f32 %v166_v26, %v1112_v25 }
  0x9f   :  { %v270_v28 = vpop.f32.mrf.mxu3 }
  0xa0   :  { %v271_v29 = vadd.f32 %v270_v28, %v167_v27 }
  0xa2   :  { %861 = vtanh.f32 %v271_v29 }
  0xa8   :  { %v862_v34 = vpop.eup %861 }
  0xa9   :  { %v295_v36 = vmul.f32 0.5, %v862_v34 }
  0xab   :  { %v297_v37 = vadd.f32 0.5, %v295_v36  ;;  %v210_v50 = vpop.f32.mrf.mxu1 }
  0xac   :  { %v211_v52 = vadd.f32 %v210_v50, %v1115_v30  ;;  %v118_v50 = vld [vmem:[%s1259_s0 + $0x38] sm:$0xff] }
  0xad   :  { %v299_v40 = vmul.f32 0.0, %v297_v37 }
  0xaf   :  { %v290_v33 = vpop.f32.mrf.mxu3 }
  0xb0   :  { %v291_v35 = vadd.f32 %v290_v33, %v208_v32 }
  0xb2   :  { %863 = vtanh.f32 %v291_v35 }
  0xb3   :  { %v213_v24 = vpop.f32.mrf.mxu1 }
  0xb4   :  { %v214_v27 = vadd.f32 %v213_v24, %v1115_v30 }
  0xb5   :  { %v169_v49 = vpop.f32.mrf.mxu0 }
  0xb6   :  { %v170_v51 = vadd.f32 %v169_v49, %v1112_v25 }
  0xb8   :  { %v864_v38 = vpop.eup %863 }
  0xb9   :  { %v300_v39 = vmul.f32 %v864_v38, %v297_v37  ;;  %v296_v43 = vmul.f32 0.5, %v864_v38 }
  0xbb   :  { %302 = vrot.lane.b32.xlu0 %v300_v39, %s968_s26  ;;  %v298_v44 = vadd.f32 0.5, %v296_v43 }
  0xbd   :  { %v172_v18 = vpop.f32.mrf.mxu0 }
  0xbe   :  { %v173_v26 = vadd.f32 %v172_v18, %v1112_v25 }
 0x12d   :  { %v303_v41 = vpop.permute.xlu0 %302 }
 0x12e   :  { %v305_v42 = vadd.f32 %v303_v41, %v299_v40 }
 0x130   :  { %865 = vtanh.f32 %v305_v42 }
 0x136   :  { %v866_v45 = vpop.eup %865 }
 0x137   :  { %v307_v46 = vmul.f32 %v866_v45, %v298_v44  ;;  %v114_v45 = vld [vmem:[%s1259_s0 + $0x18] sm:$0xff] }
 0x138   :  { %825 = vmatmul.msk.f32.gmra.mxu0 %vm124_vm0, %v114_v45  ;;  %833 = vmatmul.msk.f32.gmra.mxu1 %vm124_vm0, %v114_v45 }
 0x139   :  { %311 = vrot.lane.b32.xlu0 %v307_v46, %s968_s26 }
 0x1ab   :  { %v312_v48 = vpop.permute.xlu0 %311 }
 0x1ac   :  { %838 = vmatmul.msk.f32.vlgmr.msra.gmra.mxu2 %vm249_vm1, %v312_v48  ;;  %839 = vmatmul.msk.f32.vlgmr.msra.gmra.mxu3 %vm249_vm1, %v312_v48 }
 0x1ad   :  { %447 = vmatpush.msra.mxu2 %v995_v0  ;;  %467 = vmatpush.msra.mxu3 %v1029_v15 }
 0x1af   :  { %448 = vmatpush.msra.mxu2 %v997_v1  ;;  %468 = vmatpush.msra.mxu3 %v1035_v16 }
 0x1b1   :  { %449 = vmatpush.msra.mxu2 %v1001_v2  ;;  %469 = vmatpush.msra.mxu3 %v1040_v17 }
 0x1b3   :  { %450 = vmatpush.msra.mxu2 %v1005_v4  ;;  %470 = vmatpush.msra.mxu3 %v1045_v19 }
 0x1b5   :  { %451 = vmatpush.msra.mxu2 %v1009_v7  ;;  %471 = vmatpush.msra.mxu3 %v1051_v20 }
 0x1b7   :  { %452 = vmatpush.msra.mxu2 %v1015_v11  ;;  %472 = vmatpush.msra.mxu3 %v1057_v21 }
 0x1b9   :  { %453 = vmatpush.msra.mxu2 %v1020_v13  ;;  %473 = vmatpush.msra.mxu3 %v1063_v22 }
 0x1bb   :  { %454 = vmatpush.msra.mxu2 %v1025_v14  ;;  %474 = vmatpush.msra.mxu3 %v1069_v23 }
 0x22f   :  { %v332_v53 = vpop.f32.mrf.mxu2  ;;  %v352_v54 = vpop.f32.mrf.mxu3 }
 0x230   :  { %v333_v55 = vadd.f32 %v332_v53, %v170_v51  ;;  %v353_v56 = vadd.f32 %v352_v54, %v211_v52 }
 0x232   :  { %867 = vtanh.f32 %v333_v55 }
 0x233   :  { %869 = vtanh.f32 %v353_v56 }
 0x238   :  { %v868_v57 = vpop.eup %867 }
 0x239   :  { %v357_v58 = vmul.f32 0.5, %v868_v57  ;;  %v870_v60 = vpop.eup %869 }
 0x23a   :  { %v358_v5 = vmul.f32 0.5, %v870_v60 }
 0x23b   :  { %v359_v59 = vadd.f32 0.5, %v357_v58 }
 0x23c   :  { %v360_v6 = vadd.f32 0.5, %v358_v5 }
 0x23d   :  { %v362_v61 = vmul.f32 %v870_v60, %v359_v59  ;;  %v361_v62 = vmul.f32 %v359_v59, %v305_v42 }
 0x23f   :  { %364 = vrot.lane.b32.xlu1 %v362_v61, %s968_s26 }
 0x2b1   :  { %v365_v63 = vpop.permute.xlu1 %364 }
 0x2b2   :  { %v367_v3 = vadd.f32 %v365_v63, %v361_v62 }
 0x2b4   :  { %871 = vtanh.f32 %v367_v3 }
 0x2ba   :  { %v872_v8 = vpop.eup %871 }
 0x2bb   :  { %v369_v9 = vmul.f32 %v872_v8, %v360_v6 }
 0x2bd   :  { %373 = vrot.lane.b32.xlu1 %v369_v9, %s968_s26 }
 0x32f   :  { %v374_v12 = vpop.permute.xlu1 %373 }
 0x330   :  { %840 = vmatmul.msk.f32.vlgmr.msrb.gmra.mxu2 %vm249_vm1, %v374_v12  ;;  %841 = vmatmul.msk.f32.vlgmr.msrb.gmra.mxu3 %vm249_vm1, %v374_v12 }
 0x331   :  { %571 = vmatpush.msrb.mxu2 %v995_v0  ;;  %591 = vmatpush.msrb.mxu3 %v1029_v15 }
 0x333   :  { %572 = vmatpush.msrb.mxu2 %v997_v1  ;;  %592 = vmatpush.msrb.mxu3 %v1035_v16 }
 0x335   :  { %573 = vmatpush.msrb.mxu2 %v1001_v2  ;;  %593 = vmatpush.msrb.mxu3 %v1040_v17 }
 0x337   :  { %574 = vmatpush.msrb.mxu2 %v1005_v4  ;;  %594 = vmatpush.msrb.mxu3 %v1045_v19 }
 0x339   :  { %575 = vmatpush.msrb.mxu2 %v1009_v7  ;;  %595 = vmatpush.msrb.mxu3 %v1051_v20 }
 0x33b   :  { %576 = vmatpush.msrb.mxu2 %v1015_v11  ;;  %596 = vmatpush.msrb.mxu3 %v1057_v21 }
 0x33d   :  { %577 = vmatpush.msrb.mxu2 %v1020_v13  ;;  %597 = vmatpush.msrb.mxu3 %v1063_v22 }
 0x33f   :  { %578 = vmatpush.msrb.mxu2 %v1025_v14  ;;  %598 = vmatpush.msrb.mxu3 %v1069_v23 }
 0x3b3   :  { %v394_v28 = vpop.f32.mrf.mxu2  ;;  %v414_v29 = vpop.f32.mrf.mxu3 }
 0x3b4   :  { %v395_v31 = vadd.f32 %v394_v28, %v173_v26  ;;  %v415_v32 = vadd.f32 %v414_v29, %v214_v27 }
 0x3b6   :  { %873 = vtanh.f32 %v395_v31 }
 0x3b7   :  { %875 = vtanh.f32 %v415_v32 }
 0x3bc   :  { %v874_v33 = vpop.eup %873 }
 0x3bd   :  { %v419_v34 = vmul.f32 0.5, %v874_v33  ;;  %v876_v36 = vpop.eup %875 }
 0x3be   :  { %v420_v41 = vmul.f32 0.5, %v876_v36 }
 0x3bf   :  { %v421_v35 = vadd.f32 0.5, %v419_v34 }
 0x3c0   :  { %v422_v42 = vadd.f32 0.5, %v420_v41 }
 0x3c1   :  { %v424_v37 = vmul.f32 %v876_v36, %v421_v35  ;;  %v423_v38 = vmul.f32 %v421_v35, %v367_v3 }
 0x3c3   :  { %426 = vrot.lane.b32.xlu2 %v424_v37, %s968_s26 }
 0x41d   :  { %v427_v39 = vpop.permute.xlu2 %426 }
 0x41e   :  { %v429_v40 = vadd.f32 %v427_v39, %v423_v38 }
 0x420   :  { %877 = vtanh.f32 %v429_v40 }
 0x426   :  { %v878_v43 = vpop.eup %877 }
 0x427   :  { %v431_v44 = vmul.f32 %v878_v43, %v422_v42 }
 0x429   :  { %435 = vrot.lane.b32.xlu2 %v431_v44, %s968_s26 }
 0x483   :  { %v436_v46 = vpop.permute.xlu2 %435 }
 0x484   :  { %842 = vmatmul.msk.f32.vlgmr.msra.gmra.mxu2 %vm249_vm1, %v436_v46  ;;  %843 = vmatmul.msk.f32.vlgmr.msra.gmra.mxu3 %vm249_vm1, %v436_v46 }
 0x485   :  { %695 = vmatpush.msra.mxu2 %v995_v0  ;;  %715 = vmatpush.msra.mxu3 %v1029_v15  ;;  %v175_v0 = vpop.f32.mrf.mxu0 }
 0x487   :  { %696 = vmatpush.msra.mxu2 %v997_v1  ;;  %716 = vmatpush.msra.mxu3 %v1035_v16  ;;  %v216_v1 = vpop.f32.mrf.mxu1 }
 0x489   :  { %697 = vmatpush.msra.mxu2 %v1001_v2  ;;  %717 = vmatpush.msra.mxu3 %v1040_v17  ;;  %v176_v2 = vadd.f32 %v175_v0, %v1112_v25 }
 0x48b   :  { %698 = vmatpush.msra.mxu2 %v1005_v4  ;;  %718 = vmatpush.msra.mxu3 %v1045_v19  ;;  %v217_v4 = vadd.f32 %v216_v1, %v1115_v30 }
 0x48d   :  { %699 = vmatpush.msra.mxu2 %v1009_v7  ;;  %719 = vmatpush.msra.mxu3 %v1051_v20 }
 0x48f   :  { %700 = vmatpush.msra.mxu2 %v1015_v11  ;;  %720 = vmatpush.msra.mxu3 %v1057_v21 }
 0x491   :  { %701 = vmatpush.msra.mxu2 %v1020_v13  ;;  %721 = vmatpush.msra.mxu3 %v1063_v22  ;;  %v116_v22 = vld [vmem:[%s1259_s0 + $0x28] sm:$0xff] }
 0x493   :  { %702 = vmatpush.msra.mxu2 %v1025_v14  ;;  %722 = vmatpush.msra.mxu3 %v1069_v23  ;;  %v115_v14 = vld [vmem:[%s1259_s0 + $0x20] sm:$0xff]  ;;  %v117_v23 = vld [vmem:[%s1259_s0 + $0x30] sm:$0xff] }
 0x494   :  { %826 = vmatmul.msk.f32.gmra.mxu0 %vm124_vm0, %v115_v14  ;;  %834 = vmatmul.msk.f32.gmra.mxu1 %vm124_vm0, %v115_v14 }
 0x49c   :  { %827 = vmatmul.msk.f32.gmra.mxu0 %vm124_vm0, %v116_v22  ;;  %835 = vmatmul.msk.f32.gmra.mxu1 %vm124_vm0, %v116_v22 }
 0x4a4   :  { %828 = vmatmul.msk.f32.gmra.mxu0 %vm124_vm0, %v117_v23  ;;  %836 = vmatmul.msk.f32.gmra.mxu1 %vm124_vm0, %v117_v23 }
 0x4ac   :  { %829 = vmatmul.msk.f32.gmra.mxu0 %vm124_vm0, %v118_v50  ;;  %837 = vmatmul.msk.f32.gmra.mxu1 %vm124_vm0, %v118_v50 }
 0x507   :  { %v456_v7 = vpop.f32.mrf.mxu2  ;;  %v476_v15 = vpop.f32.mrf.mxu3 }
 0x508   :  { %v457_v16 = vadd.f32 %v456_v7, %v176_v2  ;;  %v477_v11 = vadd.f32 %v476_v15, %v217_v4 }
 0x50a   :  { %879 = vtanh.f32 %v457_v16 }
 0x50b   :  { %881 = vtanh.f32 %v477_v11 }
 0x510   :  { %v880_v17 = vpop.eup %879 }
 0x511   :  { %v481_v13 = vmul.f32 0.5, %v880_v17  ;;  %v882_v20 = vpop.eup %881  ;;  %v178_v56 = vpop.f32.mrf.mxu0 }
 0x512   :  { %v482_v51 = vmul.f32 0.5, %v882_v20  ;;  %v219_v57 = vpop.f32.mrf.mxu1  ;;  %v179_v3 = vadd.f32 %v178_v56, %v1112_v25 }
 0x513   :  { %v483_v19 = vadd.f32 0.5, %v481_v13  ;;  %v220_v8 = vadd.f32 %v219_v57, %v1115_v30 }
 0x514   :  { %v484_v52 = vadd.f32 0.5, %v482_v51 }
 0x515   :  { %v486_v21 = vmul.f32 %v882_v20, %v483_v19  ;;  %v485_v47 = vmul.f32 %v483_v19, %v429_v40 }
 0x517   :  { %488 = vrot.lane.b32.xlu0 %v486_v21, %s968_s26 }
 0x519   :  { %v181_v58 = vpop.f32.mrf.mxu0 }
 0x51a   :  { %v222_v59 = vpop.f32.mrf.mxu1  ;;  %v182_v37 = vadd.f32 %v181_v58, %v1112_v25 }
 0x51b   :  { %v223_v40 = vadd.f32 %v222_v59, %v1115_v30 }
 0x521   :  { %v184_v60 = vpop.f32.mrf.mxu0 }
 0x522   :  { %v225_v61 = vpop.f32.mrf.mxu1  ;;  %v185_v13 = vadd.f32 %v184_v60, %v1112_v25 }
 0x523   :  { %v226_v21 = vadd.f32 %v225_v61, %v1115_v30 }
 0x529   :  { %v1223_v62 = vpop.f32.mrf.mxu0 }
 0x52a   :  { %v1225_v63 = vpop.f32.mrf.mxu1  ;;  %v188_v59 = vadd.f32 %v1223_v62, %v1112_v25  ;;  %v75_v25 = vld [vmem:[#allocation5 + $0x28] sm:$0xff]  ;;  %v74_v62 = vld [vmem:[#allocation5 + $0x20] sm:$0xff] }
 0x589   :  { %v489_v48 = vpop.permute.xlu0 %488 }
 0x58a   :  { %v491_v49 = vadd.f32 %v489_v48, %v485_v47 }
 0x58c   :  { %883 = vtanh.f32 %v491_v49 }
 0x592   :  { %v884_v53 = vpop.eup %883 }
 0x593   :  { %v493_v54 = vmul.f32 %v884_v53, %v484_v52 }
 0x595   :  { %497 = vrot.lane.b32.xlu1 %v493_v54, %s968_s26 }
 0x607   :  { %v498_v55 = vpop.permute.xlu1 %497 }
 0x608   :  { %844 = vmatmul.msk.f32.vlgmr.msrb.gmra.mxu0 %vm249_vm1, %v498_v55  ;;  %845 = vmatmul.msk.f32.vlgmr.msrb.gmra.mxu1 %vm249_vm1, %v498_v55 }
 0x685   :  { %v518_v5 = vpop.f32.mrf.mxu0  ;;  %v538_v6 = vpop.f32.mrf.mxu1 }
 0x686   :  { %v519_v9 = vadd.f32 %v518_v5, %v179_v3  ;;  %v539_v10 = vadd.f32 %v538_v6, %v220_v8  ;;  %v229_v3 = vadd.f32 %v1225_v63, %v1115_v30  ;;  %v72_v30 = vld [vmem:[#allocation5 + $0x10] sm:$0xff]  ;;  %v71_v63 = vld [vmem:[#allocation5 + $0x8] sm:$0xff] }
 0x688   :  { %885 = vtanh.f32 %v519_v9 }
 0x689   :  { %887 = vtanh.f32 %v539_v10 }
 0x68e   :  { %v886_v12 = vpop.eup %885 }
 0x68f   :  { %v543_v18 = vmul.f32 0.5, %v886_v12  ;;  %v888_v26 = vpop.eup %887 }
 0x690   :  { %v544_v32 = vmul.f32 0.5, %v888_v26 }
 0x691   :  { %v545_v24 = vadd.f32 0.5, %v543_v18 }
 0x692   :  { %v546_v33 = vadd.f32 0.5, %v544_v32 }
 0x693   :  { %v548_v27 = vmul.f32 %v888_v26, %v545_v24  ;;  %v547_v28 = vmul.f32 %v545_v24, %v491_v49  ;;  %v77_v24 = vld [vmem:[#allocation5 + $0x38] sm:$0xff]  ;;  %v76_v26 = vld [vmem:[#allocation5 + $0x30] sm:$0xff] }
 0x694   :  { %756 = vmatpush.msrb.mxu0 %v77_v24 }
 0x695   :  { %550 = vrot.lane.b32.xlu2 %v548_v27, %s968_s26  ;;  %v73_v27 = vld [vmem:[#allocation5 + $0x18] sm:$0xff] }
 0x696   :  { %757 = vmatpush.msrb.mxu0 %v76_v26 }
 0x698   :  { %758 = vmatpush.msrb.mxu0 %v75_v25 }
 0x69a   :  { %759 = vmatpush.msrb.mxu0 %v74_v62 }
 0x69c   :  { %760 = vmatpush.msrb.mxu0 %v73_v27 }
 0x69e   :  { %761 = vmatpush.msrb.mxu0 %v72_v30 }
 0x6a0   :  { %762 = vmatpush.msrb.mxu0 %v71_v63 }
 0x6ef   :  { %v551_v29 = vpop.permute.xlu2 %550 }
 0x6f0   :  { %v553_v31 = vadd.f32 %v551_v29, %v547_v28  ;;  %v70_v28 = vld [vmem:[#allocation5] sm:$0xff] }
 0x6f1   :  { %763 = vmatpush.msrb.mxu0 %v70_v28 }
 0x6f2   :  { %889 = vtanh.f32 %v553_v31 }
 0x6f8   :  { %v890_v34 = vpop.eup %889 }
 0x6f9   :  { %v555_v35 = vmul.f32 %v890_v34, %v546_v33 }
 0x6fb   :  { %559 = vrot.lane.b32.xlu0 %v555_v35, %s968_s26 }
 0x76d   :  { %v560_v36 = vpop.permute.xlu0 %559 }
 0x76e   :  { %846 = vmatmul.msk.f32.vlgmr.msrb.gmra.mxu2 %vm249_vm1, %v560_v36  ;;  %847 = vmatmul.msk.f32.vlgmr.msrb.gmra.mxu3 %vm249_vm1, %v560_v36 }
 0x7f1   :  { %v580_v38 = vpop.f32.mrf.mxu2  ;;  %v600_v39 = vpop.f32.mrf.mxu3 }
 0x7f2   :  { %v581_v41 = vadd.f32 %v580_v38, %v182_v37  ;;  %v601_v42 = vadd.f32 %v600_v39, %v223_v40  ;;  %v93_v37 = vld [vmem:[#allocation5 + $0xb8] sm:$0xff]  ;;  %v92_v38 = vld [vmem:[#allocation5 + $0xb0] sm:$0xff]  ;;  %v91_v39 = vld [vmem:[#allocation5 + $0xa8] sm:$0xff] }
 0x7f3   :  { %770 = vmatpush.msrb.mxu1 %v93_v37  ;;  %v90_v40 = vld [vmem:[#allocation5 + $0xa0] sm:$0xff] }
 0x7f4   :  { %891 = vtanh.f32 %v581_v41  ;;  %v89_v41 = vld [vmem:[#allocation5 + $0x98] sm:$0xff] }
 0x7f5   :  { %893 = vtanh.f32 %v601_v42  ;;  %771 = vmatpush.msrb.mxu1 %v92_v38  ;;  %v88_v42 = vld [vmem:[#allocation5 + $0x90] sm:$0xff] }
 0x7f7   :  { %772 = vmatpush.msrb.mxu1 %v91_v39 }
 0x7f9   :  { %773 = vmatpush.msrb.mxu1 %v90_v40 }
 0x7fa   :  { %v892_v43 = vpop.eup %891 }
 0x7fb   :  { %v605_v44 = vmul.f32 0.5, %v892_v43  ;;  %v894_v46 = vpop.eup %893  ;;  %774 = vmatpush.msrb.mxu1 %v89_v41  ;;  %v87_v43 = vld [vmem:[#allocation5 + $0x88] sm:$0xff] }
 0x7fc   :  { %v606_v7 = vmul.f32 0.5, %v894_v46 }
 0x7fd   :  { %v607_v45 = vadd.f32 0.5, %v605_v44  ;;  %775 = vmatpush.msrb.mxu1 %v88_v42  ;;  %v86_v44 = vld [vmem:[#allocation5 + $0x80] sm:$0xff] }
 0x7fe   :  { %v608_v15 = vadd.f32 0.5, %v606_v7 }
 0x7ff   :  { %v610_v0 = vmul.f32 %v894_v46, %v607_v45  ;;  %v609_v1 = vmul.f32 %v607_v45, %v553_v31  ;;  %776 = vmatpush.msrb.mxu1 %v87_v43  ;;  %v85_v45 = vld [vmem:[#allocation5 + $0x78] sm:$0xff]  ;;  %v84_v46 = vld [vmem:[#allocation5 + $0x70] sm:$0xff] }
 0x801   :  { %612 = vrot.lane.b32.xlu1 %v610_v0, %s968_s26  ;;  %777 = vmatpush.msrb.mxu1 %v86_v44  ;;  %v83_v0 = vld [vmem:[#allocation5 + $0x68] sm:$0xff] }
 0x803   :  { %778 = vmatpush.msrb.mxu1 %v85_v45 }
 0x805   :  { %779 = vmatpush.msrb.mxu1 %v84_v46 }
 0x807   :  { %780 = vmatpush.msrb.mxu1 %v83_v0 }
 0x873   :  { %v613_v2 = vpop.permute.xlu1 %612 }
 0x874   :  { %v615_v4 = vadd.f32 %v613_v2, %v609_v1  ;;  %v82_v1 = vld [vmem:[#allocation5 + $0x60] sm:$0xff]  ;;  %v81_v2 = vld [vmem:[#allocation5 + $0x58] sm:$0xff] }
 0x875   :  { %781 = vmatpush.msrb.mxu1 %v82_v1 }
 0x876   :  { %895 = vtanh.f32 %v615_v4 }
 0x877   :  { %782 = vmatpush.msrb.mxu1 %v81_v2 }
 0x87c   :  { %v896_v16 = vpop.eup %895 }
 0x87d   :  { %v617_v11 = vmul.f32 %v896_v16, %v608_v15  ;;  %v80_v15 = vld [vmem:[#allocation5 + $0x50] sm:$0xff]  ;;  %v79_v16 = vld [vmem:[#allocation5 + $0x48] sm:$0xff] }
 0x87e   :  { %783 = vmatpush.msrb.mxu1 %v80_v15 }
 0x87f   :  { %621 = vrot.lane.b32.xlu2 %v617_v11, %s968_s26  ;;  %v78_v11 = vld [vmem:[#allocation5 + $0x40] sm:$0xff] }
 0x880   :  { %784 = vmatpush.msrb.mxu1 %v79_v16 }
 0x882   :  { %785 = vmatpush.msrb.mxu1 %v78_v11 }
 0x8d9   :  { %v622_v17 = vpop.permute.xlu2 %621 }
 0x8da   :  { %848 = vmatmul.msk.f32.vlgmr.msra.gmra.mxu0 %vm249_vm1, %v622_v17  ;;  %849 = vmatmul.msk.f32.vlgmr.msra.gmra.mxu1 %vm249_vm1, %v622_v17  ;;  %v109_v17 = vld [vmem:[#allocation5 + $0x138] sm:$0xff] }
 0x8db   :  { %792 = vmatpush.msrb.mxu2 %v109_v17 }
 0x957   :  { %v642_v19 = vpop.f32.mrf.mxu0  ;;  %v662_v20 = vpop.f32.mrf.mxu1 }
 0x958   :  { %v643_v14 = vadd.f32 %v642_v19, %v185_v13  ;;  %v663_v22 = vadd.f32 %v662_v20, %v226_v21  ;;  %v108_v13 = vld [vmem:[#allocation5 + $0x130] sm:$0xff]  ;;  %v107_v19 = vld [vmem:[#allocation5 + $0x128] sm:$0xff]  ;;  %v106_v20 = vld [vmem:[#allocation5 + $0x120] sm:$0xff] }
 0x959   :  { %793 = vmatpush.msrb.mxu2 %v108_v13  ;;  %v105_v21 = vld [vmem:[#allocation5 + $0x118] sm:$0xff] }
 0x95a   :  { %897 = vtanh.f32 %v643_v14  ;;  %v104_v14 = vld [vmem:[#allocation5 + $0x110] sm:$0xff] }
 0x95b   :  { %899 = vtanh.f32 %v663_v22  ;;  %794 = vmatpush.msrb.mxu2 %v107_v19  ;;  %v103_v22 = vld [vmem:[#allocation5 + $0x108] sm:$0xff] }
 0x95d   :  { %795 = vmatpush.msrb.mxu2 %v106_v20 }
 0x95f   :  { %796 = vmatpush.msrb.mxu2 %v105_v21 }
 0x960   :  { %v898_v23 = vpop.eup %897 }
 0x961   :  { %v667_v47 = vmul.f32 0.5, %v898_v23  ;;  %v900_v49 = vpop.eup %899  ;;  %797 = vmatpush.msrb.mxu2 %v104_v14  ;;  %v102_v23 = vld [vmem:[#allocation5 + $0x100] sm:$0xff] }
 0x962   :  { %v668_v54 = vmul.f32 0.5, %v900_v49 }
 0x963   :  { %v669_v48 = vadd.f32 0.5, %v667_v47  ;;  %798 = vmatpush.msrb.mxu2 %v103_v22  ;;  %v101_v47 = vld [vmem:[#allocation5 + $0xf8] sm:$0xff] }
 0x964   :  { %v670_v55 = vadd.f32 0.5, %v668_v54 }
 0x965   :  { %v672_v50 = vmul.f32 %v900_v49, %v669_v48  ;;  %v671_v51 = vmul.f32 %v669_v48, %v615_v4  ;;  %799 = vmatpush.msrb.mxu2 %v102_v23  ;;  %v100_v48 = vld [vmem:[#allocation5 + $0xf0] sm:$0xff]  ;;  %v99_v49 = vld [vmem:[#allocation5 + $0xe8] sm:$0xff] }
 0x967   :  { %674 = vrot.lane.b32.xlu0 %v672_v50, %s968_s26  ;;  %800 = vmatpush.msrb.mxu2 %v101_v47  ;;  %v98_v50 = vld [vmem:[#allocation5 + $0xe0] sm:$0xff] }
 0x969   :  { %801 = vmatpush.msrb.mxu2 %v100_v48 }
 0x96b   :  { %802 = vmatpush.msrb.mxu2 %v99_v49 }
 0x96d   :  { %803 = vmatpush.msrb.mxu2 %v98_v50 }
 0x9d9   :  { %v675_v52 = vpop.permute.xlu0 %674 }
 0x9da   :  { %v677_v53 = vadd.f32 %v675_v52, %v671_v51  ;;  %v110_v51 = vld [vmem:[#allocation5 + $0x140] sm:$0xff]  ;;  %v97_v52 = vld [vmem:[#allocation5 + $0xd8] sm:$0xff] }
 0x9db   :  { %804 = vmatpush.msrb.mxu2 %v97_v52 }
 0x9dc   :  { %901 = vtanh.f32 %v677_v53 }
 0x9e2   :  { %v902_v56 = vpop.eup %901 }
 0x9e3   :  { %v679_v57 = vmul.f32 %v902_v56, %v670_v55 }
 0x9e5   :  { %683 = vrot.lane.b32.xlu1 %v679_v57, %s968_s26  ;;  %v96_v57 = vld [vmem:[#allocation5 + $0xd0] sm:$0xff] }
 0x9e6   :  { %805 = vmatpush.msrb.mxu2 %v96_v57 }
 0xa57   :  { %v684_v58 = vpop.permute.xlu1 %683 }
 0xa58   :  { %850 = vmatmul.msk.f32.vlgmr.msra.gmra.mxu2 %vm249_vm1, %v684_v58  ;;  %851 = vmatmul.msk.f32.vlgmr.msra.gmra.mxu3 %vm249_vm1, %v684_v58  ;;  %v95_v58 = vld [vmem:[#allocation5 + $0xc8] sm:$0xff] }
 0xa59   :  { %806 = vmatpush.msrb.mxu2 %v95_v58 }
 0xadb   :  { %v704_v60 = vpop.f32.mrf.mxu2  ;;  %v724_v61 = vpop.f32.mrf.mxu3 }
 0xadc   :  { %v705_v5 = vadd.f32 %v704_v60, %v188_v59  ;;  %v725_v6 = vadd.f32 %v724_v61, %v229_v3  ;;  %v94_v59 = vld [vmem:[#allocation5 + $0xc0] sm:$0xff]  ;;  %v769_v60 = vperm.slane %v110_v51, 1 }
 0xadd   :  { %807 = vmatpush.msrb.mxu2 %v94_v59 }
 0xade   :  { %903 = vtanh.f32 %v705_v5 }
 0xadf   :  { %905 = vtanh.f32 %v725_v6  ;;  %v791_v6 = vperm.slane %v110_v51, 2 }
 0xae4   :  { %v904_v8 = vpop.eup %903 }
 0xae5   :  { %v729_v9 = vmul.f32 0.5, %v904_v8  ;;  %v906_v12 = vpop.eup %905 }
 0xae6   :  { %v730_v33 = vmul.f32 0.5, %v906_v12 }
 0xae7   :  { %v731_v10 = vadd.f32 0.5, %v729_v9 }
 0xae8   :  { %v732_v34 = vadd.f32 0.5, %v730_v33 }
 0xae9   :  { %v734_v18 = vmul.f32 %v906_v12, %v731_v10  ;;  %v733_v29 = vmul.f32 %v731_v10, %v677_v53  ;;  %v742_v53 = vperm.slane %v110_v51, 0 }
 0xaeb   :  { %736 = vrot.lane.b32.xlu2 %v734_v18, %s968_s26 }
 0xb45   :  { %v737_v31 = vpop.permute.xlu2 %736 }
 0xb46   :  { %v739_v32 = vadd.f32 %v737_v31, %v733_v29 }
 0xb48   :  { %907 = vtanh.f32 %v739_v32 }
 0xb4e   :  { %v908_v35 = vpop.eup %907 }
 0xb4f   :  { %v741_v36 = vmul.f32 %v908_v35, %v732_v34 }
 0xb51   :  { %744 = vrot.lane.b32.xlu0 %v741_v36, %s968_s26 }
 0xbc3   :  { %v745_v4 = vpop.permute.xlu0 %744 }
 0xbc4   :  { %v813_v7 = vsel %vm249_vm1, %v745_v4, %v739_v32  ;;  %852 = vmatmul.msk.f32.vlgmr.msrb.gmra.mxu0 %vm249_vm1, %v745_v4 }
 0xbc5   :  { %814 = vst [vmem:[%s1262_s3] sm:$0xff] %v813_v7 }
 0xc41   :  { %v765_v54 = vpop.f32.mrf.mxu0 }
 0xc42   :  { %v766_v55 = vadd.f32 %v765_v54, %v742_v53 }
 0xc44   :  { %v768_v56 = vmax.f32 %v766_v55, 0.0 }
 0xc46   :  { %786 = vmatmul.f32.vlgmr.msrb.gmra.mxu1 %v768_v56 }
 0xcc3   :  { %v787_v61 = vpop.f32.mrf.mxu1 }
 0xcc4   :  { %v788_v3 = vadd.f32 %v787_v61, %v769_v60 }
 0xcc6   :  { %v790_v5 = vmax.f32 %v788_v3, 0.0 }
 0xcc8   :  { %808 = vmatmul.f32.vlgmr.msrb.gmra.mxu2 %v790_v5 }
 0xd4b   :  { %v809_v8 = vpop.f32.mrf.mxu2 }
 0xd4c   :  { %v810_v9 = vadd.f32 %v809_v8, %v791_v6 }
 0xd4e   :  { %815 = vst [vmem:[%s1262_s3 + $0x8] sm:$0xff] %v810_v9 }
 0xd4f   :  { %820 = vsyncpa [#allocation4], 1 }
 0xd50   :  { %821 = vsyncpa [#allocation6], 1 }

</bundles_post_ra>
